<compile_context>
chip_gen: v7x
topology: tpu7x:2x2x1
jax: 0.10.0
libtpu: 0.0.40
codegen_flags: <defaults>
</compile_context>

<pallas_src>
import jax
import jax.numpy as jnp
from jax.experimental import pallas as pl
from jax.experimental.pallas import tpu as pltpu


def _round_up(a, b):
    return ((a + b - 1) // b) * b


def ff_kernel(x_ref, wc_ref, bc_ref, w2_ref, b2_ref, w3_ref, b3_ref, o_ref):
    """One row-tile of FF: fused (layer1 | shortcut) matmul, then 2 more layers."""
    dp = w2_ref.shape[0]          # padded feature dim (static, multiple of 128)
    x = x_ref[...]                # (tm, Dp), compute dtype (f32 or bf16)

    # Biases read once, kept in f32 for the epilogue.
    bc = bc_ref[...]              # (1, 2*Dp)
    b2 = b2_ref[...]              # (1, Dp)
    b3 = b3_ref[...]              # (1, Dp)

    # Fused first matmul: x @ [W1 | Ws] -> (tm, 2*Dp), f32 accumulate.
    hs = jnp.dot(x, wc_ref[...], preferred_element_type=jnp.float32) + bc
    h = jnp.maximum(hs[:, :dp], 0.0)      # layer-1 activation (f32)
    s = hs[:, dp:]                        # linear shortcut (f32)

    # Layer 2.
    h = jnp.dot(h.astype(w2_ref.dtype), w2_ref[...],
                preferred_element_type=jnp.float32) + b2
    h = jnp.maximum(h, 0.0)

    # Layer 3.
    h = jnp.dot(h.astype(w3_ref.dtype), w3_ref[...],
                preferred_element_type=jnp.float32) + b3
    h = jnp.maximum(h, 0.0)

    o_ref[...] = (h + s).astype(o_ref.dtype)


def ff_forward(x, params, *, tm=None, compute_dtype=jnp.float32):
    """Forward pass of FF.

    params: dict with w1,b1,w2,b2,w3,b3,ws,bs; weights stored PyTorch-style as
    (D_out, D_in), biases as (D,).  Matmul operands are cast to
    `compute_dtype` (f32 accumulation always); bias/ReLU/add stay f32.
    """
    N, D = x.shape
    out_dtype = x.dtype

    # Lane-dense padded feature dim.
    Dp = _round_up(D, 128)

    # Row tile: big enough to amortize per-step overhead, small enough that
    # large N still yields a multi-step grid (feeds both TCs on v7x).
    if tm is None:
        tm = min(512, _round_up(N, 8))
    tm = max(8, _round_up(tm, 8))
    Np = _round_up(N, tm)
    grid = (Np // tm,)

    # ---- weight / input prep (glue, stays in JAX) -------------------------
    def pad_w(w):                       # (D_out, D_in) -> (Dp, Dp), transposed
        return jnp.pad(w.T, ((0, Dp - D), (0, Dp - D)))

    def pad_b(b):                       # (D,) -> (1, Dp)
        return jnp.pad(b, (0, Dp - D)).reshape(1, Dp).astype(jnp.float32)

    w1 = pad_w(params["w1"]).astype(compute_dtype)
    w2 = pad_w(params["w2"]).astype(compute_dtype)
    w3 = pad_w(params["w3"]).astype(compute_dtype)
    ws = pad_w(params["ws"]).astype(compute_dtype)
    b1 = pad_b(params["b1"])
    b2 = pad_b(params["b2"])
    b3 = pad_b(params["b3"])
    bs = pad_b(params["bs"])

    # Fuse layer-1 and shortcut weights/biases: x @ [W1 | Ws] in one MXU pass.
    wc = jnp.concatenate([w1, ws], axis=1)      # (Dp, 2*Dp)
    bc = jnp.concatenate([b1, bs], axis=1)      # (1, 2*Dp)

    # Pad rows to a multiple of tm, pad features to Dp, cast matmul operand.
    x_p = jnp.pad(x, ((0, Np - N), (0, Dp - D))).astype(compute_dtype)

    # ---- specs ------------------------------------------------------------
    x_spec = pl.BlockSpec((tm, Dp), lambda i: (i, 0))
    o_spec = pl.BlockSpec((tm, Dp), lambda i: (i, 0))
    wc_spec = pl.BlockSpec((Dp, 2 * Dp), lambda i: (0, 0))
    bc_spec = pl.BlockSpec((1, 2 * Dp), lambda i: (0, 0))
    w_spec = pl.BlockSpec((Dp, Dp), lambda i: (0, 0))
    b_spec = pl.BlockSpec((1, Dp), lambda i: (0, 0))

    out_p = pl.pallas_call(
        ff_kernel,
        out_shape=jax.ShapeDtypeStruct((Np, Dp), out_dtype),
        grid_spec=pltpu.PrefetchScalarGridSpec(
            num_scalar_prefetch=0,
            grid=grid,
            in_specs=[x_spec,
                      wc_spec, bc_spec,
                      w_spec, b_spec,
                      w_spec, b_spec],
            out_specs=o_spec,
        ),
        compiler_params=pltpu.CompilerParams(
            dimension_semantics=("parallel",)),
    )(x_p, wc, bc, w2, b2, w3, b3)

    return out_p[:N, :D]


def init_ff_params(key, input_dim):
    """Deterministic init mimicking torch.nn.Linear default (U[-1/sqrt(D), 1/sqrt(D)])."""
    bound = 1.0 / jnp.sqrt(jnp.float32(input_dim))
    keys = jax.random.split(key, 8)

    def u(k, shape):
        return jax.random.uniform(k, shape, jnp.float32, -bound, bound)

    return {
        "w1": u(keys[0], (input_dim, input_dim)), "b1": u(keys[1], (input_dim,)),
        "w2": u(keys[2], (input_dim, input_dim)), "b2": u(keys[3], (input_dim,)),
        "w3": u(keys[4], (input_dim, input_dim)), "b3": u(keys[5], (input_dim,)),
        "ws": u(keys[6], (input_dim, input_dim)), "bs": u(keys[7], (input_dim,)),
    }


def ff_reference(x, p):
    """Pure-JAX reference for correctness check (matches the PyTorch module)."""
    h = jax.nn.relu(x @ p["w1"].T + p["b1"])
    h = jax.nn.relu(h @ p["w2"].T + p["b2"])
    h = jax.nn.relu(h @ p["w3"].T + p["b3"])
    return h + (x @ p["ws"].T + p["bs"])


if __name__ == "__main__":
    key = jax.random.PRNGKey(0)
    k_x, k_p = jax.random.split(key)

    N, D = 64, 32  # small shapes: 64 "nodes/graphs", hidden dim 32
    x = jax.random.normal(k_x, (N, D), jnp.float32)
    params = init_ff_params(k_p, D)

    # f32 path — exact vs reference.
    out = jax.block_until_ready(ff_forward(x, params))
    ref = ff_reference(x, params)
    assert out.shape == (N, D)
    assert jnp.allclose(out, ref, atol=1e-5, rtol=1e-5), "f32 mismatch vs reference"

    # bf16 matmul operands (v6e/v7x MXU regime), f32 accumulate — loose tol.
    out_bf16 = jax.block_until_ready(
        ff_forward(x, params, compute_dtype=jnp.bfloat16))
    assert jnp.allclose(out_bf16, ref, atol=5e-2, rtol=5e-2), "bf16 mismatch vs reference"

    # Ragged row count (not a multiple of the tile) handled by padding.
    x_ragged = jax.random.normal(k_x, (37, D), jnp.float32)
    out_ragged = jax.block_until_ready(ff_forward(x_ragged, params))
    assert jnp.allclose(out_ragged, ff_reference(x_ragged, params),
                        atol=1e-5, rtol=1e-5), "ragged-N mismatch vs reference"

    print("KERNEL_OK")
</pallas_src>

<mosaic_0001>
module attributes {stable_mosaic.version = 11 : i64} {
  func.func @ff_kernel(%arg0: i32, %arg1: memref<64x128xf32, #tpu.memory_space<vmem>>, %arg2: memref<128x256xf32, #tpu.memory_space<vmem>>, %arg3: memref<1x256xf32, #tpu.memory_space<vmem>>, %arg4: memref<128x128xf32, #tpu.memory_space<vmem>>, %arg5: memref<1x128xf32, #tpu.memory_space<vmem>>, %arg6: memref<128x128xf32, #tpu.memory_space<vmem>>, %arg7: memref<1x128xf32, #tpu.memory_space<vmem>>, %arg8: memref<64x128xf32, #tpu.memory_space<vmem>>) attributes {dimension_semantics = [#tpu.dimension_semantics<parallel>], iteration_bounds = array<i64: 1>, scalar_prefetch = 0 : i64, scratch_operands = 0 : i64, tpu.core_type = #tpu.core_type<tc>, window_params = [{transform_indices = @transform_0, window_bounds = array<i64: 64, 128>}, {pipeline_mode = #tpu.pipeline_mode<synchronous>, transform_indices = @transform_1, window_bounds = array<i64: 128, 256>}, {pipeline_mode = #tpu.pipeline_mode<synchronous>, transform_indices = @transform_2, window_bounds = array<i64: 1, 256>}, {pipeline_mode = #tpu.pipeline_mode<synchronous>, transform_indices = @transform_3, window_bounds = array<i64: 128, 128>}, {pipeline_mode = #tpu.pipeline_mode<synchronous>, transform_indices = @transform_4, window_bounds = array<i64: 1, 128>}, {pipeline_mode = #tpu.pipeline_mode<synchronous>, transform_indices = @transform_5, window_bounds = array<i64: 128, 128>}, {pipeline_mode = #tpu.pipeline_mode<synchronous>, transform_indices = @transform_6, window_bounds = array<i64: 1, 128>}, {transform_indices = @transform_7, window_bounds = array<i64: 64, 128>}]} {
    %c0 = arith.constant 0 : index
    %c0_0 = arith.constant 0 : index
    %0 = vector.load %arg1[%c0, %c0_0] : memref<64x128xf32, #tpu.memory_space<vmem>>, vector<64x128xf32>
    %c0_1 = arith.constant 0 : index
    %c0_2 = arith.constant 0 : index
    %1 = vector.load %arg3[%c0_1, %c0_2] : memref<1x256xf32, #tpu.memory_space<vmem>>, vector<1x256xf32>
    %c0_3 = arith.constant 0 : index
    %c0_4 = arith.constant 0 : index
    %2 = vector.load %arg5[%c0_3, %c0_4] : memref<1x128xf32, #tpu.memory_space<vmem>>, vector<1x128xf32>
    %c0_5 = arith.constant 0 : index
    %c0_6 = arith.constant 0 : index
    %3 = vector.load %arg7[%c0_5, %c0_6] : memref<1x128xf32, #tpu.memory_space<vmem>>, vector<1x128xf32>
    %c0_7 = arith.constant 0 : index
    %c0_8 = arith.constant 0 : index
    %4 = vector.load %arg2[%c0_7, %c0_8] : memref<128x256xf32, #tpu.memory_space<vmem>>, vector<128x256xf32>
    %cst = arith.constant dense<0.000000e+00> : vector<64x256xf32>
    %5 = tpu.matmul %0, %4, %cst {dimension_numbers = #tpu.dot_dimension_numbers<[1], [0], [0], [1], [0, 0, 1, 1], [], []>} : vector<64x128xf32>, vector<128x256xf32>, vector<64x256xf32> -> vector<64x256xf32>
    %6 = vector.broadcast %1 : vector<1x256xf32> to vector<64x256xf32>
    %7 = arith.addf %5, %6 : vector<64x256xf32>
    %8 = vector.extract_strided_slice %7 {offsets = [0, 0], sizes = [64, 128], strides = [1, 1]} : vector<64x256xf32> to vector<64x128xf32>
    %cst_9 = arith.constant 0.000000e+00 : f32
    %9 = vector.broadcast %cst_9 : f32 to vector<64x128xf32>
    %10 = arith.maximumf %8, %9 : vector<64x128xf32>
    %11 = vector.extract_strided_slice %7 {offsets = [0, 128], sizes = [64, 128], strides = [1, 1]} : vector<64x256xf32> to vector<64x128xf32>
    %c0_10 = arith.constant 0 : index
    %c0_11 = arith.constant 0 : index
    %12 = vector.load %arg4[%c0_10, %c0_11] : memref<128x128xf32, #tpu.memory_space<vmem>>, vector<128x128xf32>
    %cst_12 = arith.constant dense<0.000000e+00> : vector<64x128xf32>
    %13 = tpu.matmul %10, %12, %cst_12 {dimension_numbers = #tpu.dot_dimension_numbers<[1], [0], [0], [1], [0, 0, 1, 1], [], []>} : vector<64x128xf32>, vector<128x128xf32>, vector<64x128xf32> -> vector<64x128xf32>
    %14 = vector.broadcast %2 : vector<1x128xf32> to vector<64x128xf32>
    %15 = arith.addf %13, %14 : vector<64x128xf32>
    %cst_13 = arith.constant 0.000000e+00 : f32
    %16 = vector.broadcast %cst_13 : f32 to vector<64x128xf32>
    %17 = arith.maximumf %15, %16 : vector<64x128xf32>
    %c0_14 = arith.constant 0 : index
    %c0_15 = arith.constant 0 : index
    %18 = vector.load %arg6[%c0_14, %c0_15] : memref<128x128xf32, #tpu.memory_space<vmem>>, vector<128x128xf32>
    %cst_16 = arith.constant dense<0.000000e+00> : vector<64x128xf32>
    %19 = tpu.matmul %17, %18, %cst_16 {dimension_numbers = #tpu.dot_dimension_numbers<[1], [0], [0], [1], [0, 0, 1, 1], [], []>} : vector<64x128xf32>, vector<128x128xf32>, vector<64x128xf32> -> vector<64x128xf32>
    %20 = vector.broadcast %3 : vector<1x128xf32> to vector<64x128xf32>
    %21 = arith.addf %19, %20 : vector<64x128xf32>
    %cst_17 = arith.constant 0.000000e+00 : f32
    %22 = vector.broadcast %cst_17 : f32 to vector<64x128xf32>
    %23 = arith.maximumf %21, %22 : vector<64x128xf32>
    %24 = arith.addf %23, %11 : vector<64x128xf32>
    %c0_18 = arith.constant 0 : index
    %c0_19 = arith.constant 0 : index
    %25 = vector.load %arg8[%c0_18, %c0_19] : memref<64x128xf32, #tpu.memory_space<vmem>>, vector<64x128xf32>
    tpu.vector_store %arg8[%c0_18, %c0_19], %24 {strides = array<i32>} : memref<64x128xf32, #tpu.memory_space<vmem>>, vector<64x128xf32>,
    return
  }
  func.func @transform_0(%arg0: i32) -> (i32, i32) {
    %c0_i32 = arith.constant 0 : i32
    %c0_i32_0 = arith.constant 0 : i32
    return %arg0, %c0_i32 : i32, i32
  }
  func.func @transform_1(%arg0: i32) -> (i32, i32) {
    %c0_i32 = arith.constant 0 : i32
    %c0_i32_0 = arith.constant 0 : i32
    %c0_i32_1 = arith.constant 0 : i32
    return %c0_i32, %c0_i32_0 : i32, i32
  }
  func.func @transform_2(%arg0: i32) -> (i32, i32) {
    %c0_i32 = arith.constant 0 : i32
    %c0_i32_0 = arith.constant 0 : i32
    %c0_i32_1 = arith.constant 0 : i32
    return %c0_i32, %c0_i32_0 : i32, i32
  }
  func.func @transform_3(%arg0: i32) -> (i32, i32) {
    %c0_i32 = arith.constant 0 : i32
    %c0_i32_0 = arith.constant 0 : i32
    %c0_i32_1 = arith.constant 0 : i32
    return %c0_i32, %c0_i32_0 : i32, i32
  }
  func.func @transform_4(%arg0: i32) -> (i32, i32) {
    %c0_i32 = arith.constant 0 : i32
    %c0_i32_0 = arith.constant 0 : i32
    %c0_i32_1 = arith.constant 0 : i32
    return %c0_i32, %c0_i32_0 : i32, i32
  }
  func.func @transform_5(%arg0: i32) -> (i32, i32) {
    %c0_i32 = arith.constant 0 : i32
    %c0_i32_0 = arith.constant 0 : i32
    %c0_i32_1 = arith.constant 0 : i32
    return %c0_i32, %c0_i32_0 : i32, i32
  }
  func.func @transform_6(%arg0: i32) -> (i32, i32) {
    %c0_i32 = arith.constant 0 : i32
    %c0_i32_0 = arith.constant 0 : i32
    %c0_i32_1 = arith.constant 0 : i32
    return %c0_i32, %c0_i32_0 : i32, i32
  }
  func.func @transform_7(%arg0: i32) -> (i32, i32) {
    %c0_i32 = arith.constant 0 : i32
    %c0_i32_0 = arith.constant 0 : i32
    return %arg0, %c0_i32 : i32, i32
  }
}

</mosaic_0001>

<bundles_post_ra>
// kernel: tpu_custom_call.1
= control target key start
LH: loop header
LB: loop body
LE: loop exit
PB: predicated region body
PF: predicated region fallthrough
CT: control target
= control target key end

     0   :  { %12 = vsyncpa [#allocation3], 0  ;;  %s1138_s0 = inlined_call_operand.hbm [shape: f32[64,128], index: 0, kind: input, shape index: {}]   ;;  %s1139_s1 = inlined_call_operand.hbm [shape: f32[128,256], index: 1, kind: input, shape index: {}]   ;;  %s1140_s2 = inlined_call_operand.vmem [shape: f32[1,256], index: 2, kind: input, shape index: {}]   ;;  %s1141_s3 = inlined_call_operand.hbm [shape: f32[128,128], index: 3, kind: input, shape index: {}]   ;;  %s1142_s4 = inlined_call_operand.vmem [shape: f32[1,128], index: 4, kind: input, shape index: {}]   ;;  %s1143_s5 = inlined_call_operand.hbm [shape: f32[128,128], index: 5, kind: input, shape index: {}]   ;;  %s1144_s6 = inlined_call_operand.vmem [shape: f32[1,128], index: 6, kind: input, shape index: {}]   ;;  %s1145_s7 = inlined_call_operand.hbm [shape: f32[64,128], index: 7, kind: output, shape index: {}]  }
   0x1   :  { %13 = vsyncpa [#allocation6], 0 }
   0x2   :  { %14 = vsyncpa [#allocation9], 0 }
   0x3   :  { %15 = vsyncpa [#allocation4], 0  ;;  %s940_s24 = smov [#allocation5]   ;;  %s822_s28 = scalar_lea.hbm %s1139_s1, 4096 }
   0x4   :  { %s33_s25 = sshll.u32 %s940_s24, 4  ;;  %p823_p0 = scmp.ne.s32.totalorder %s1139_s1, %s822_s28  ;;  %s34_s25 = int_to_ptr.vmem [resolvable:$true] %s33_s25 }
   0x5   :  { %p826_p1 = scmp.lt.u32.totalorder %s822_s28, %s1139_s1 }
   0x7   :  { %p828_p2 = pnand %p826_p1, %p823_p0 }
   0x9   :  { %831 = shalt.err (!%p828_p2)
}
   0xa   :  { %s832_s10 = scalar_lea.vmem %s34_s25, 4096  ;;  %p837_p4 = scmp.lt.s32.totalorder %s34_s25, %s34_s25 }
   0xb   :  { %p833_p3 = scmp.ne.s32.totalorder %s34_s25, %s832_s10  ;;  %p838_p5 = scmp.lt.s32.totalorder %s832_s10, %s832_s10 }
   0xd   :  { %p839_p6 = por %p838_p5, %p837_p4 }
   0xf   :  { %p840_p7 = pnand %p839_p6, %p833_p3 }
  0x11   :  { %843 = shalt.err (!%p840_p7)
}
  0x12   :  { %s941_s11 = smov 256   ;;  %s942_s12 = smov 16  }
  0x13   :  { %39 = dma.hbm_to_vmem [thread:$0]  %s1139_s1, 4096, %s34_s25, [#allocation6], %s941_s11, %s941_s11, %s942_s12  }
  0x14   :  { %s943_s15 = smov [#allocation2]   ;;  %s844_s19 = scalar_lea.hbm %s1138_s0, 1024 }
  0x15   :  { %s21_s16 = sshll.u32 %s943_s15, 4  ;;  %p845_p8 = scmp.ne.s32.totalorder %s1138_s0, %s844_s19  ;;  %s22_s16 = int_to_ptr.vmem [resolvable:$true] %s21_s16 }
  0x16   :  { %p848_p9 = scmp.lt.u32.totalorder %s844_s19, %s1138_s0 }
  0x18   :  { %p850_p10 = pnand %p848_p9, %p845_p8 }
  0x1a   :  { %853 = shalt.err (!%p850_p10)
}
  0x1b   :  { %s854_s24 = scalar_lea.vmem %s22_s16, 1024  ;;  %p859_p12 = scmp.lt.s32.totalorder %s22_s16, %s22_s16 }
  0x1c   :  { %p855_p11 = scmp.ne.s32.totalorder %s22_s16, %s854_s24  ;;  %p860_p13 = scmp.lt.s32.totalorder %s854_s24, %s854_s24 }
  0x1e   :  { %p861_p0 = por %p860_p13, %p859_p12 }
  0x20   :  { %p862_p1 = pnand %p861_p0, %p855_p11 }
  0x22   :  { %865 = shalt.err (!%p862_p1)
}
  0x23   :  { %s944_s1 = smov 128   ;;  %s945_s25 = smov 8  }
  0x24   :  { %27 = dma.hbm_to_vmem [thread:$0]  %s1138_s0, 1024, %s22_s16, [#allocation3], %s944_s1, %s944_s1, %s945_s25  }
  0x25   :  { %s946_s28 = smov [#allocation7]   ;;  %s947_s30 = smov [#allocation8]  }
  0x26   :  { %s47_s29 = sshll.u32 %s946_s28, 4  ;;  %s61_s8 = sshll.u32 %s947_s30, 4  ;;  %s48_s29 = int_to_ptr.vmem [resolvable:$true] %s47_s29  ;;  %s1017_s8 = int_to_ptr.vmem [resolvable:$true] %s61_s8 }
  0x27   :  { %s866_s11 = scalar_lea.hbm %s1141_s3, 2048 }
  0x28   :  { %p867_p2 = scmp.ne.s32.totalorder %s1141_s3, %s866_s11  ;;  %p870_p3 = scmp.lt.u32.totalorder %s866_s11, %s1141_s3 }
  0x2a   :  { %p872_p4 = pnand %p870_p3, %p867_p2 }
  0x2c   :  { %875 = shalt.err (!%p872_p4)
}
  0x2d   :  { %s876_s0 = scalar_lea.vmem %s48_s29, 2048  ;;  %p881_p6 = scmp.lt.s32.totalorder %s48_s29, %s48_s29 }
  0x2e   :  { %p877_p5 = scmp.ne.s32.totalorder %s48_s29, %s876_s0  ;;  %p882_p7 = scmp.lt.s32.totalorder %s876_s0, %s876_s0 }
  0x30   :  { %p883_p8 = por %p882_p7, %p881_p6 }
  0x32   :  { %p884_p9 = pnand %p883_p8, %p877_p5 }
  0x34   :  { %887 = shalt.err (!%p884_p9)
}
  0x35   :  { %53 = dma.hbm_to_vmem [thread:$0]  %s1141_s3, 2048, %s48_s29, [#allocation6], %s944_s1, %s944_s1, %s945_s25  }
  0x36   :  { %s888_s20 = scalar_lea.hbm %s1143_s5, 2048 }
  0x37   :  { %p889_p10 = scmp.ne.s32.totalorder %s1143_s5, %s888_s20  ;;  %p892_p11 = scmp.lt.u32.totalorder %s888_s20, %s1143_s5 }
  0x39   :  { %p894_p12 = pnand %p892_p11, %p889_p10 }
  0x3b   :  { %897 = shalt.err (!%p894_p12)
}
  0x3c   :  { %s898_s26 = scalar_lea.vmem %s1017_s8, 2048  ;;  %p903_p0 = scmp.lt.s32.totalorder %s1017_s8, %s1017_s8 }
  0x3d   :  { %p899_p13 = scmp.ne.s32.totalorder %s1017_s8, %s898_s26  ;;  %p904_p1 = scmp.lt.s32.totalorder %s898_s26, %s898_s26 }
  0x3f   :  { %p905_p2 = por %p904_p1, %p903_p0 }
  0x41   :  { %p906_p3 = pnand %p905_p2, %p899_p13 }
  0x43   :  { %909 = shalt.err (!%p906_p3)
}
  0x44   :  { %67 = dma.hbm_to_vmem [thread:$0]  %s1143_s5, 2048, %s1017_s8, [#allocation9], %s944_s1, %s944_s1, %s945_s25  }
  0x45   :  { %932 = dma.done.wait [#allocation3], 1024  }
  0x46   :  { %933 = vsyncadd [#allocation3], 4294966272 }
  0x47   :  { %934 = dma.done.wait [#allocation6], 6144  }
  0x48   :  { %935 = vsyncadd [#allocation6], 4294961152 }
  0x49   :  { %936 = dma.done.wait [#allocation9], 2048  }
  0x4a   :  { %937 = vsyncadd [#allocation9], 4294965248  ;;  %v948_v0 = vmov 0.0   ;;  %v94_v1 = vld [vmem:[#allocation5 + $0x8] sm:$0xff]  ;;  %v96_v2 = vld [vmem:[#allocation5 + $0x18] sm:$0xff] }
  0x4b   :  { %200 = vmatprep.mubr.f32.mxu0 %v948_v0  ;;  %v93_v3 = vld [vmem:[#allocation5] sm:$0xff]  ;;  %v700_v4 = vpack.c.bf16 %v96_v2, %v94_v1  ;;  %v95_v5 = vld [vmem:[#allocation5 + $0x10] sm:$0xff]  ;;  %v98_v6 = vld [vmem:[#allocation5 + $0x28] sm:$0xff] }
  0x4c   :  { %v100_v7 = vld [vmem:[#allocation5 + $0x38] sm:$0xff]  ;;  %v702_v8 = vpack.c.bf16 %v95_v5, %v93_v3  ;;  %v97_v10 = vld [vmem:[#allocation5 + $0x20] sm:$0xff]  ;;  %v99_v11 = vld [vmem:[#allocation5 + $0x30] sm:$0xff] }
  0x4d   :  { %v704_v9 = vpack.c.bf16 %v100_v7, %v98_v6  ;;  %v102_v12 = vld [vmem:[#allocation5 + $0x48] sm:$0xff]  ;;  %701 = vmatprep.subr.bf16.mxu0 %v700_v4  ;;  %v104_v13 = vld [vmem:[#allocation5 + $0x58] sm:$0xff]  ;;  %v706_v14 = vpack.c.bf16 %v99_v11, %v97_v10  ;;  %v101_v16 = vld [vmem:[#allocation5 + $0x40] sm:$0xff] }
  0x4e   :  { %703 = vmatpush1.bf16.msra.mxu0 %v702_v8  ;;  %v708_v15 = vpack.c.bf16 %v104_v13, %v102_v12  ;;  %v103_v17 = vld [vmem:[#allocation5 + $0x50] sm:$0xff]  ;;  %v106_v18 = vld [vmem:[#allocation5 + $0x68] sm:$0xff]  ;;  %v108_v19 = vld [vmem:[#allocation5 + $0x78] sm:$0xff]  ;;  %v126_v12 = vlaneseq }
  0x4f   :  { %705 = vmatprep.subr.bf16.mxu0 %v704_v9  ;;  %v710_v20 = vpack.c.bf16 %v103_v17, %v101_v16  ;;  %v712_v21 = vpack.c.bf16 %v108_v19, %v106_v18  ;;  %v105_v22 = vld [vmem:[#allocation5 + $0x60] sm:$0xff]  ;;  %v107_v23 = vld [vmem:[#allocation5 + $0x70] sm:$0xff]  ;;  %v110_v24 = vld [vmem:[#allocation5 + $0x88] sm:$0xff] }
  0x50   :  { %v112_v25 = vld [vmem:[#allocation5 + $0x98] sm:$0xff]  ;;  %v714_v26 = vpack.c.bf16 %v107_v23, %v105_v22  ;;  %v109_v27 = vld [vmem:[#allocation5 + $0x80] sm:$0xff]  ;;  %v111_v28 = vld [vmem:[#allocation5 + $0x90] sm:$0xff]  ;;  %v127_v13 = vshrl.u32 %v126_v12, 7 }
  0x51   :  { %v716_v29 = vpack.c.bf16 %v112_v25, %v110_v24  ;;  %v114_v30 = vld [vmem:[#allocation5 + $0xa8] sm:$0xff]  ;;  %v257_v31 = vld [vmem:[#allocation7] sm:$0xff]  ;;  %v116_v33 = vld [vmem:[#allocation5 + $0xb8] sm:$0xff]  ;;  %v718_v40 = vpack.c.bf16 %v111_v28, %v109_v27 }
  0x52   :  { %707 = vmatpush1.bf16.msra.mxu0 %v706_v14  ;;  %v258_v32 = vld [vmem:[#allocation7 + $0x8] sm:$0xff]  ;;  %v259_v35 = vld [vmem:[#allocation7 + $0x10] sm:$0xff]  ;;  %v260_v36 = vld [vmem:[#allocation7 + $0x18] sm:$0xff]  ;;  %v720_v41 = vpack.c.bf16 %v116_v33, %v114_v30 }
  0x53   :  { %709 = vmatprep.subr.bf16.mxu0 %v708_v15  ;;  %v732_v34 = vpack.c.bf16 %v258_v32, %v257_v31  ;;  %v736_v37 = vpack.c.bf16 %v260_v36, %v259_v35  ;;  %v261_v38 = vld [vmem:[#allocation7 + $0x20] sm:$0xff]  ;;  %v262_v39 = vld [vmem:[#allocation7 + $0x28] sm:$0xff]  ;;  %v115_v43 = vld [vmem:[#allocation5 + $0xb0] sm:$0xff]  ;;  %v132_v15 = vsub.s32 1, %v127_v13 }
  0x54   :  { %v113_v42 = vld [vmem:[#allocation5 + $0xa0] sm:$0xff]  ;;  %v118_v44 = vld [vmem:[#allocation5 + $0xc8] sm:$0xff]  ;;  %v120_v45 = vld [vmem:[#allocation5 + $0xd8] sm:$0xff]  ;;  %v740_v46 = vpack.c.bf16 %v262_v39, %v261_v38 }
  0x55   :  { %733 = vmatprep.subr.bf16.mxu1 %v732_v34  ;;  %v263_v47 = vld [vmem:[#allocation7 + $0x30] sm:$0xff]  ;;  %v264_v48 = vld [vmem:[#allocation7 + $0x38] sm:$0xff]  ;;  %v722_v49 = vpack.c.bf16 %v115_v43, %v113_v42  ;;  %v724_v50 = vpack.c.bf16 %v120_v45, %v118_v44  ;;  %v117_v51 = vld [vmem:[#allocation5 + $0xc0] sm:$0xff]  ;;  %v128_v43 = vsub.s32 0, %v127_v13 }
  0x56   :  { %711 = vmatpush1.bf16.msra.mxu0 %v710_v20  ;;  %735 = vmatpush3.bf16.msra.mxu1 %v732_v34  ;;  %v119_v52 = vld [vmem:[#allocation5 + $0xd0] sm:$0xff]  ;;  %v122_v53 = vld [vmem:[#allocation5 + $0xe8] sm:$0xff]  ;;  %v124_v54 = vld [vmem:[#allocation5 + $0xf8] sm:$0xff]  ;;  %v744_v55 = vpack.c.bf16 %v264_v48, %v263_v47 }
  0x57   :  { %713 = vmatprep.subr.bf16.mxu0 %v712_v21  ;;  %737 = vmatprep.subr.bf16.mxu1 %v736_v37  ;;  %v265_v56 = vld [vmem:[#allocation7 + $0x40] sm:$0xff]  ;;  %v266_v57 = vld [vmem:[#allocation7 + $0x48] sm:$0xff]  ;;  %v726_v58 = vpack.c.bf16 %v119_v52, %v117_v51  ;;  %v728_v59 = vpack.c.bf16 %v124_v54, %v122_v53  ;;  %v123_v61 = vld [vmem:[#allocation5 + $0xf0] sm:$0xff] }
  0x58   :  { %v121_v60 = vld [vmem:[#allocation5 + $0xe0] sm:$0xff]  ;;  %v748_v62 = vpack.c.bf16 %v266_v57, %v265_v56  ;;  %v267_v63 = vld [vmem:[#allocation7 + $0x50] sm:$0xff]  ;;  %v268_v1 = vld [vmem:[#allocation7 + $0x58] sm:$0xff] }
  0x59   :  { %v730_v2 = vpack.c.bf16 %v123_v61, %v121_v60  ;;  %v752_v3 = vpack.c.bf16 %v268_v1, %v267_v63  ;;  %v82_v4 = vld [vmem:[#allocation2] sm:$0xff]  ;;  %v83_v5 = vld [vmem:[#allocation2 + $0x8] sm:$0xff]  ;;  %v84_v6 = vld [vmem:[#allocation2 + $0x10] sm:$0xff] }
  0x5a   :  { %715 = vmatpush1.bf16.msra.mxu0 %v714_v26  ;;  %739 = vmatpush3.bf16.msra.mxu1 %v736_v37  ;;  %v85_v7 = vld [vmem:[#allocation2 + $0x18] sm:$0xff]  ;;  %v86_v8 = vld [vmem:[#allocation2 + $0x20] sm:$0xff]  ;;  %v87_v9 = vld [vmem:[#allocation2 + $0x28] sm:$0xff] }
  0x5b   :  { %717 = vmatprep.subr.bf16.mxu0 %v716_v29  ;;  %741 = vmatprep.subr.bf16.mxu1 %v740_v46  ;;  %v88_v10 = vld [vmem:[#allocation2 + $0x30] sm:$0xff]  ;;  %v89_v11 = vld [vmem:[#allocation2 + $0x38] sm:$0xff]  ;;  %v90_v14 = vld [vmem:[%s1140_s2] sm:$0x3] }
  0x5c   :  { %v269_v16 = vld [vmem:[#allocation7 + $0x60] sm:$0xff]  ;;  %v270_v17 = vld [vmem:[#allocation7 + $0x68] sm:$0xff]  ;;  %v1065_v19 = vrot.slane %v90_v14, %v132_v15  ;;  %v271_v20 = vld [vmem:[#allocation7 + $0x70] sm:$0xff]  ;;  %v129_v44 = vrot.slane %v90_v14, %v128_v43 }
  0x5d   :  { %v756_v18 = vpack.c.bf16 %v270_v17, %v269_v16  ;;  %v272_v21 = vld [vmem:[#allocation7 + $0x78] sm:$0xff]  ;;  %v393_v23 = vld [vmem:[#allocation8 + $0x8] sm:$0xff]  ;;  %v394_v24 = vld [vmem:[#allocation8 + $0x10] sm:$0xff] }
  0x5e   :  { %719 = vmatpush1.bf16.msra.mxu0 %v718_v40  ;;  %743 = vmatpush3.bf16.msra.mxu1 %v740_v46  ;;  %v760_v22 = vpack.c.bf16 %v272_v21, %v271_v20  ;;  %v395_v26 = vld [vmem:[#allocation8 + $0x18] sm:$0xff]  ;;  %v396_v28 = vld [vmem:[#allocation8 + $0x20] sm:$0xff]  ;;  %v397_v29 = vld [vmem:[#allocation8 + $0x28] sm:$0xff] }
  0x5f   :  { %721 = vmatprep.subr.bf16.mxu0 %v720_v41  ;;  %745 = vmatprep.subr.bf16.mxu1 %v744_v55  ;;  %v768_v27 = vpack.c.bf16 %v395_v26, %v394_v24  ;;  %v772_v30 = vpack.c.bf16 %v397_v29, %v396_v28  ;;  %v398_v31 = vld [vmem:[#allocation8 + $0x30] sm:$0xff]  ;;  %v399_v32 = vld [vmem:[#allocation8 + $0x38] sm:$0xff]  ;;  %v400_v34 = vld [vmem:[#allocation8 + $0x40] sm:$0xff] }
  0x60   :  { %v776_v33 = vpack.c.bf16 %v399_v32, %v398_v31  ;;  %v401_v35 = vld [vmem:[#allocation8 + $0x48] sm:$0xff]  ;;  %v402_v37 = vld [vmem:[#allocation8 + $0x50] sm:$0xff]  ;;  %v403_v38 = vld [vmem:[#allocation8 + $0x58] sm:$0xff] }
  0x61   :  { %v1067_v36 = vpack.c.bf16 %v401_v35, %v400_v34  ;;  %v1070_v39 = vpack.c.bf16 %v403_v38, %v402_v37  ;;  %v404_v40 = vld [vmem:[#allocation8 + $0x60] sm:$0xff]  ;;  %v405_v41 = vld [vmem:[#allocation8 + $0x68] sm:$0xff] }
  0x62   :  { %723 = vmatpush1.bf16.msra.mxu0 %v722_v49  ;;  %747 = vmatpush3.bf16.msra.mxu1 %v744_v55  ;;  %v1074_v42 = vpack.c.bf16 %v405_v41, %v404_v40 }
  0x63   :  { %725 = vmatprep.subr.bf16.mxu0 %v724_v50  ;;  %749 = vmatprep.subr.bf16.mxu1 %v748_v62 }
  0x66   :  { %727 = vmatpush1.bf16.msra.mxu0 %v726_v58  ;;  %751 = vmatpush3.bf16.msra.mxu1 %v748_v62 }
  0x67   :  { %729 = vmatprep.subr.bf16.mxu0 %v728_v59  ;;  %753 = vmatprep.subr.bf16.mxu1 %v752_v3 }
  0x6a   :  { %731 = vmatpush1.bf16.msra.mxu0 %v730_v2  ;;  %755 = vmatpush3.bf16.msra.mxu1 %v752_v3 }
  0x6b   :  { %757 = vmatprep.subr.bf16.mxu1 %v756_v18 }
  0x6d   :  { %201 = vmatmul.mubr.f32.vlgmr.msra.gmra.mrb[0].mxu0 %v82_v4 }
  0x6e   :  { %206 = vmatprep.mubr.f32.mxu0 %v948_v0  ;;  %759 = vmatpush3.bf16.msra.mxu1 %v756_v18 }
  0x6f   :  { %761 = vmatprep.subr.bf16.mxu1 %v760_v22 }
  0x71   :  { %207 = vmatmul.mubr.f32.gmra.mrb[2].mxu0 %v83_v5 }
  0x72   :  { %212 = vmatprep.mubr.f32.mxu0 %v948_v0  ;;  %763 = vmatpush3.bf16.msra.mxu1 %v760_v22 }
  0x75   :  { %213 = vmatmul.mubr.f32.gmra.mrb[4].mxu0 %v84_v6 }
  0x76   :  { %218 = vmatprep.mubr.f32.mxu0 %v948_v0 }
  0x79   :  { %219 = vmatmul.mubr.f32.gmra.mrb[6].mxu0 %v85_v7 }
  0x7a   :  { %224 = vmatprep.mubr.f32.mxu0 %v948_v0 }
  0x7d   :  { %225 = vmatmul.mubr.f32.gmra.mrb[8].mxu0 %v86_v8 }
  0x7e   :  { %230 = vmatprep.mubr.f32.mxu0 %v948_v0 }
  0x81   :  { %231 = vmatmul.mubr.f32.gmra.mrb[10].mxu0 %v87_v9 }
  0x82   :  { %236 = vmatprep.mubr.f32.mxu0 %v948_v0 }
  0x85   :  { %237 = vmatmul.mubr.f32.gmra.mrb[12].mxu0 %v88_v10 }
  0x86   :  { %242 = vmatprep.mubr.f32.mxu0 %v948_v0  ;;  %v392_v0 = vld [vmem:[#allocation8] sm:$0xff] }
  0x87   :  { %v764_v25 = vpack.c.bf16 %v393_v23, %v392_v0  ;;  %v406_v0 = vld [vmem:[#allocation8 + $0x70] sm:$0xff]  ;;  %v407_v23 = vld [vmem:[#allocation8 + $0x78] sm:$0xff] }
  0x88   :  { %v792_v24 = vpack.c.bf16 %v407_v23, %v406_v0 }
  0x89   :  { %243 = vmatmul.mubr.f32.gmra.mrb[14].mxu0 %v89_v11  ;;  %765 = vmatprep.subr.bf16.mxu0 %v764_v25 }
  0x8a   :  { %796 = vmatprep.subr.bf16.mxu1 %v764_v25  ;;  %767 = vmatpush3.bf16.msra.mxu0 %v764_v25 }
  0x8b   :  { %769 = vmatprep.subr.bf16.mxu0 %v768_v27 }
  0x8e   :  { %771 = vmatpush3.bf16.msra.mxu0 %v768_v27 }
  0x8f   :  { %773 = vmatprep.subr.bf16.mxu0 %v772_v30 }
  0x92   :  { %775 = vmatpush3.bf16.msra.mxu0 %v772_v30 }
  0x93   :  { %777 = vmatprep.subr.bf16.mxu0 %v776_v33 }
  0x96   :  { %779 = vmatpush3.bf16.msra.mxu0 %v776_v33 }
  0x97   :  { %781 = vmatprep.subr.bf16.mxu0 %v1067_v36 }
  0x9a   :  { %783 = vmatpush3.bf16.msra.mxu0 %v1067_v36 }
  0x9b   :  { %785 = vmatprep.subr.bf16.mxu0 %v1070_v39 }
  0x9e   :  { %787 = vmatpush3.bf16.msra.mxu0 %v1070_v39 }
  0x9f   :  { %789 = vmatprep.subr.bf16.mxu0 %v1074_v42 }
  0xa2   :  { %791 = vmatpush3.bf16.msra.mxu0 %v1074_v42 }
  0xa3   :  { %793 = vmatprep.subr.bf16.mxu0 %v792_v24 }
  0xa6   :  { %795 = vmatpush3.bf16.msra.mxu0 %v792_v24 }
 0x140   :  { %v202_v45 = vpop.f32.mrb[0].mxu0 }
 0x141   :  { %v204_v46 = vpop.f32.mrb[1].mxu0  ;;  %v203_v47 = vadd.f32 %v202_v45, %v129_v44 }
 0x142   :  { %v1080_v48 = vadd.f32 %v204_v46, %v1065_v19 }
 0x143   :  { %v249_v49 = vmax.f32 %v203_v47, 0.0 }
 0x144   :  { %v208_v50 = vpop.f32.mrb[2].mxu0 }
 0x145   :  { %v209_v51 = vadd.f32 %v208_v50, %v129_v44  ;;  %v210_v52 = vpop.f32.mrb[3].mxu0  ;;  %644 = vmatprep.mubr.f32.mxu1 %v249_v49  ;;  %v563_v50 = vld [vmem:[%s1144_s6] ss:$0 sm:$0xff]  ;;  %s949_s6 = smov [#allocation10]  }
 0x146   :  { %v1083_v53 = vadd.f32 %v210_v52, %v1065_v19  ;;  %s548_s8 = sshll.u32 %s949_s6, 4  ;;  %s549_s8 = int_to_ptr.vmem [resolvable:$true] %s548_s8 }
 0x147   :  { %v250_v54 = vmax.f32 %v209_v51, 0.0  ;;  %s910_s9 = scalar_lea.vmem %s549_s8, 1024  ;;  %p915_p5 = scmp.lt.s32.totalorder %s549_s8, %s549_s8 }
 0x148   :  { %v214_v55 = vpop.f32.mrb[4].mxu0  ;;  %p911_p4 = scmp.ne.s32.totalorder %s549_s8, %s910_s9  ;;  %p916_p6 = scmp.lt.s32.totalorder %s910_s9, %s910_s9 }
 0x149   :  { %v215_v56 = vadd.f32 %v214_v55, %v129_v44  ;;  %v216_v57 = vpop.f32.mrb[5].mxu0  ;;  %645 = vmatmul.mubr.f32.vlgmr.msra.gmra.mrb[0].mxu1 %v250_v54 }
 0x14a   :  { %v1086_v58 = vadd.f32 %v216_v57, %v1065_v19  ;;  %804 = vmatpush3.bf16.msra.mxu1 %v764_v25  ;;  %p917_p7 = por %p916_p6, %p915_p5 }
 0x14b   :  { %v251_v59 = vmax.f32 %v215_v56, 0.0  ;;  %797 = vmatprep.subr.bf16.mxu1 %v768_v27 }
 0x14c   :  { %v220_v60 = vpop.f32.mrb[6].mxu0  ;;  %p918_p8 = pnand %p917_p7, %p911_p4 }
 0x14d   :  { %v221_v61 = vadd.f32 %v220_v60, %v129_v44  ;;  %v222_v62 = vpop.f32.mrb[7].mxu0  ;;  %647 = vmatprep.mubr.f32.mxu1 %v251_v59 }
 0x14e   :  { %v1089_v63 = vadd.f32 %v222_v62, %v1065_v19  ;;  %805 = vmatpush3.bf16.msra.mxu1 %v768_v27 }
 0x14f   :  { %v252_v1 = vmax.f32 %v221_v61, 0.0  ;;  %798 = vmatprep.subr.bf16.mxu1 %v772_v30 }
 0x150   :  { %v226_v2 = vpop.f32.mrb[8].mxu0 }
 0x151   :  { %v227_v3 = vadd.f32 %v226_v2, %v129_v44  ;;  %v228_v4 = vpop.f32.mrb[9].mxu0  ;;  %648 = vmatmul.mubr.f32.gmra.mrb[2].mxu1 %v252_v1 }
 0x152   :  { %v1092_v5 = vadd.f32 %v228_v4, %v1065_v19  ;;  %806 = vmatpush3.bf16.msra.mxu1 %v772_v30 }
 0x153   :  { %v253_v6 = vmax.f32 %v227_v3, 0.0  ;;  %799 = vmatprep.subr.bf16.mxu1 %v776_v33 }
 0x154   :  { %v232_v7 = vpop.f32.mrb[10].mxu0 }
 0x155   :  { %v233_v8 = vadd.f32 %v232_v7, %v129_v44  ;;  %v234_v9 = vpop.f32.mrb[11].mxu0  ;;  %650 = vmatprep.mubr.f32.mxu1 %v253_v6 }
 0x156   :  { %v1095_v10 = vadd.f32 %v234_v9, %v1065_v19  ;;  %807 = vmatpush3.bf16.msra.mxu1 %v776_v33 }
 0x157   :  { %v254_v11 = vmax.f32 %v233_v8, 0.0  ;;  %800 = vmatprep.subr.bf16.mxu1 %v1067_v36 }
 0x158   :  { %v238_v12 = vpop.f32.mrb[12].mxu0 }
 0x159   :  { %v239_v13 = vadd.f32 %v238_v12, %v129_v44  ;;  %v240_v14 = vpop.f32.mrb[13].mxu0  ;;  %651 = vmatmul.mubr.f32.gmra.mrb[4].mxu1 %v254_v11 }
 0x15a   :  { %v1099_v15 = vadd.f32 %v240_v14, %v1065_v19  ;;  %808 = vmatpush3.bf16.msra.mxu1 %v1067_v36 }
 0x15b   :  { %v255_v16 = vmax.f32 %v239_v13, 0.0  ;;  %801 = vmatprep.subr.bf16.mxu1 %v1070_v39 }
 0x15c   :  { %v244_v17 = vpop.f32.mrb[14].mxu0 }
 0x15d   :  { %v245_v18 = vadd.f32 %v244_v17, %v129_v44  ;;  %v246_v20 = vpop.f32.mrb[15].mxu0  ;;  %653 = vmatprep.mubr.f32.mxu1 %v255_v16 }
 0x15e   :  { %v1104_v21 = vadd.f32 %v246_v20, %v1065_v19  ;;  %809 = vmatpush3.bf16.msra.mxu1 %v1070_v39  ;;  %v562_v19 = vld [vmem:[%s1142_s4] ss:$0 sm:$0xff] }
 0x15f   :  { %v256_v22 = vmax.f32 %v245_v18, 0.0  ;;  %802 = vmatprep.subr.bf16.mxu1 %v1074_v42 }
 0x161   :  { %654 = vmatmul.mubr.f32.gmra.mrb[6].mxu1 %v256_v22 }
 0x162   :  { %810 = vmatpush3.bf16.msra.mxu1 %v1074_v42 }
 0x163   :  { %803 = vmatprep.subr.bf16.mxu1 %v792_v24 }
 0x166   :  { %811 = vmatpush3.bf16.msra.mxu1 %v792_v24 }
 0x21c   :  { %v646_v25 = vpop.f32.mrb[0].mxu1 }
 0x21d   :  { %v351_v26 = vadd.f32 %v646_v25, %v562_v19  ;;  %v345_v27 = vpop.f32.mrb[1].mxu1 }
 0x21e   :  { %v346_v28 = vadd.f32 %v562_v19, %v345_v27 }
 0x21f   :  { %v385_v30 = vmax.f32 %v351_v26, 0.0 }
 0x220   :  { %v384_v29 = vmax.f32 %v346_v28, 0.0 }
 0x222   :  { %688 = vmatprep.mubr.f32.mxu0 %v384_v29 }
 0x223   :  { %689 = vmatmul.mubr.f32.vlgmr.msra.gmra.mrb[16].mxu0 %v385_v30 }
 0x224   :  { %v649_v31 = vpop.f32.mrb[2].mxu1 }
 0x225   :  { %v361_v32 = vadd.f32 %v649_v31, %v562_v19  ;;  %v355_v33 = vpop.f32.mrb[3].mxu1 }
 0x226   :  { %v356_v34 = vadd.f32 %v562_v19, %v355_v33 }
 0x227   :  { %v387_v36 = vmax.f32 %v361_v32, 0.0 }
 0x228   :  { %v386_v35 = vmax.f32 %v356_v34, 0.0 }
 0x22a   :  { %691 = vmatprep.mubr.f32.mxu0 %v386_v35 }
 0x22b   :  { %692 = vmatmul.mubr.f32.gmra.mrb[18].mxu0 %v387_v36 }
 0x22c   :  { %v652_v37 = vpop.f32.mrb[4].mxu1 }
 0x22d   :  { %v371_v38 = vadd.f32 %v652_v37, %v562_v19  ;;  %v365_v39 = vpop.f32.mrb[5].mxu1 }
 0x22e   :  { %v366_v40 = vadd.f32 %v562_v19, %v365_v39 }
 0x22f   :  { %v389_v42 = vmax.f32 %v371_v38, 0.0 }
 0x230   :  { %v388_v41 = vmax.f32 %v366_v40, 0.0 }
 0x232   :  { %694 = vmatprep.mubr.f32.mxu1 %v388_v41 }
 0x233   :  { %695 = vmatmul.mubr.f32.vlgmr.msra.gmra.mrb[8].mxu1 %v389_v42 }
 0x234   :  { %v655_v43 = vpop.f32.mrb[6].mxu1 }
 0x235   :  { %v381_v44 = vadd.f32 %v655_v43, %v562_v19  ;;  %v375_v45 = vpop.f32.mrb[7].mxu1 }
 0x236   :  { %v376_v46 = vadd.f32 %v562_v19, %v375_v45 }
 0x237   :  { %v391_v49 = vmax.f32 %v381_v44, 0.0 }
 0x238   :  { %v390_v47 = vmax.f32 %v376_v46, 0.0 }
 0x23a   :  { %697 = vmatprep.mubr.f32.mxu1 %v390_v47 }
 0x23b   :  { %698 = vmatmul.mubr.f32.gmra.mrb[10].mxu1 %v391_v49 }
 0x2f6   :  { %v690_v51 = vpop.f32.mrb[16].mxu0 }
 0x2f7   :  { %v486_v52 = vadd.f32 %v690_v51, %v563_v50  ;;  %v480_v54 = vpop.f32.mrb[17].mxu0 }
 0x2f8   :  { %v481_v55 = vadd.f32 %v563_v50, %v480_v54 }
 0x2f9   :  { %v520_v56 = vmax.f32 %v486_v52, 0.0 }
 0x2fa   :  { %v519_v57 = vmax.f32 %v481_v55, 0.0 }
 0x2fb   :  { %v528_v59 = vadd.f32 %v520_v56, %v1083_v53 }
 0x2fc   :  { %v527_v60 = vadd.f32 %v519_v57, %v1080_v48 }
 0x2fd   :  { %536 = vst [vmem:[#allocation10 + $0x8] sm:$0xff] %v528_v59 }
 0x2fe   :  { %535 = vst [vmem:[#allocation10] sm:$0xff] %v527_v60  ;;  %v693_v61 = vpop.f32.mrb[18].mxu0 }
 0x2ff   :  { %v496_v62 = vadd.f32 %v693_v61, %v563_v50  ;;  %v490_v1 = vpop.f32.mrb[19].mxu0 }
 0x300   :  { %v491_v2 = vadd.f32 %v563_v50, %v490_v1 }
 0x301   :  { %v522_v3 = vmax.f32 %v496_v62, 0.0 }
 0x302   :  { %v521_v4 = vmax.f32 %v491_v2, 0.0 }
 0x303   :  { %v530_v6 = vadd.f32 %v522_v3, %v1089_v63 }
 0x304   :  { %v529_v7 = vadd.f32 %v521_v4, %v1086_v58 }
 0x305   :  { %538 = vst [vmem:[#allocation10 + $0x18] sm:$0xff] %v530_v6 }
 0x306   :  { %537 = vst [vmem:[#allocation10 + $0x10] sm:$0xff] %v529_v7  ;;  %v696_v8 = vpop.f32.mrb[8].mxu1 }
 0x307   :  { %v506_v9 = vadd.f32 %v696_v8, %v563_v50  ;;  %v500_v11 = vpop.f32.mrb[9].mxu1 }
 0x308   :  { %v501_v53 = vadd.f32 %v563_v50, %v500_v11 }
 0x309   :  { %v524_v12 = vmax.f32 %v506_v9, 0.0 }
 0x30a   :  { %v523_v48 = vmax.f32 %v501_v53, 0.0 }
 0x30b   :  { %v532_v13 = vadd.f32 %v524_v12, %v1095_v10 }
 0x30c   :  { %v531_v14 = vadd.f32 %v523_v48, %v1092_v5 }
 0x30d   :  { %540 = vst [vmem:[#allocation10 + $0x28] sm:$0xff] %v532_v13 }
 0x30e   :  { %539 = vst [vmem:[#allocation10 + $0x20] sm:$0xff] %v531_v14  ;;  %v699_v16 = vpop.f32.mrb[10].mxu1 }
 0x30f   :  { %v516_v17 = vadd.f32 %v699_v16, %v563_v50  ;;  %v510_v18 = vpop.f32.mrb[11].mxu1 }
 0x310   :  { %v511_v63 = vadd.f32 %v563_v50, %v510_v18 }
 0x311   :  { %v526_v20 = vmax.f32 %v516_v17, 0.0 }
 0x312   :  { %v525_v58 = vmax.f32 %v511_v63, 0.0 }
 0x313   :  { %v534_v22 = vadd.f32 %v526_v20, %v1104_v21 }
 0x314   :  { %v533_v0 = vadd.f32 %v525_v58, %v1099_v15 }
 0x315   :  { %542 = vst [vmem:[#allocation10 + $0x38] sm:$0xff] %v534_v22 }
 0x316   :  { %541 = vst [vmem:[#allocation10 + $0x30] sm:$0xff] %v533_v0 }
 0x317   :  { %921 = shalt.err (!%p918_p8)
}
 0x318   :  { %s922_s12 = scalar_lea.hbm %s1145_s7, 1024 }
 0x319   :  { %p923_p9 = scmp.ne.s32.totalorder %s1145_s7, %s922_s12  ;;  %p926_p10 = scmp.lt.u32.totalorder %s922_s12, %s1145_s7 }
 0x31b   :  { %p928_p11 = pnand %p926_p10, %p923_p9 }
 0x31d   :  { %931 = shalt.err (!%p928_p11)
}
 0x31e   :  { %554 = dma.vmem_to_hbm [thread:$0]  %s549_s8, 1024, %s1145_s7, [#allocation4], %s944_s1, %s944_s1, %s945_s25  }
 0x31f   :  { %938 = dma.done.wait [#allocation4], 1024  }
 0x320   :  { %939 = vsyncadd [#allocation4], 4294966272 }
 0x321   :  { %558 = vsyncpa [#allocation3], 1 }
 0x322   :  { %559 = vsyncpa [#allocation6], 1 }
 0x323   :  { %560 = vsyncpa [#allocation9], 1 }
 0x324   :  { %561 = vsyncpa [#allocation4], 1 }

</bundles_post_ra>
